<compile_context>
chip_gen: v7x
topology: tpu7x:2x2x1
jax: 0.10.0
libtpu: 0.0.40
codegen_flags: <defaults>
</compile_context>

<pallas_src>
import math
import jax
import jax.numpy as jnp
from jax.experimental import pallas as pl
from jax.experimental.pallas import tpu as pltpu  # noqa: F401  (imported per task spec)

# ---------------- model config (small, synthetic "BERT") ----------------
VOCAB = 100
VOCAB_PAD = 128   # embedding table padded to a lane-friendly 128 rows
SEQ = 8           # sequence length
HIDDEN = 32       # bert hidden size (synthetic)
NUM_HEADS = 2
HEAD_DIM = HIDDEN // NUM_HEADS
INTER = 64        # FFN intermediate size
FC1_OUT = 128
NUM_CLASSES = 3
OUT_LANES = 128   # lane-dense padded logits width (sliced to NUM_CLASSES outside)
LN_EPS = 1e-12    # BERT layernorm eps

# ---- packed vector operand layout: one (VEC_ROWS, 128) f32 array ----
R_EMB_G = 0    # embedding layernorm gamma      (H lanes)
R_EMB_B = 1    # embedding layernorm beta       (H lanes)
R_BQKV = 2     # [bq*scale | bk | bv]           (3H lanes)
R_BO = 3       # attention output bias          (H lanes)
R_LN1_G = 4
R_LN1_B = 5
R_B1 = 6       # FFN intermediate bias          (INTER lanes)
R_B2 = 7       # FFN output bias                (H lanes)
R_LN2_G = 8
R_LN2_B = 9
R_FC1_B = 10   # classifier fc1 bias            (FC1_OUT lanes)
R_FC2_B = 11   # classifier fc2 bias, padded    (OUT_LANES lanes)
R_POS = 16     # rows R_POS .. R_POS+SEQ-1: position embeddings (H lanes each)
VEC_ROWS = R_POS + SEQ  # = 24

# ---- packed weight operand layout: one (H, WMAT_COLS) f32 array ----
#   lanes [0         : 3H       )  = [wq*scale | wk | wv]
#   lanes [3H        : 4H       )  = wo
#   lanes [4H        : 4H+INTER )  = w1
#   lanes [4H+INTER  : +FC1_OUT )  = fc1_w
WMAT_COLS = 4 * HIDDEN + INTER + FC1_OUT  # = 320


# ======================= fused Pallas kernel ==============================

def classifier_fused_kernel(ids_ref, mask_ref, wemb_ref, wmat_ref, w2_ref,
                            fc2w_ref, vec_ref, out_ref):
    """Whole batch, whole forward pass, single invocation.

    ids_ref:  (B*S, 1)          int32  token ids
    mask_ref: (B, S)            f32    attention mask (1 = real token, 0 = pad)
    wemb_ref: (VOCAB_PAD, H)    f32    word embeddings (zero-padded rows)
    wmat_ref: (H, WMAT_COLS)    f32    [wq*s | wk | wv | wo | w1 | fc1_w]
    w2_ref:   (INTER, H)        f32    FFN output weights
    fc2w_ref: (FC1_OUT, 128)    f32    fc2 weights, lane-padded
    vec_ref:  (VEC_ROWS, 128)   f32    packed biases / LN params / pos emb
    out_ref:  (B, 128)          f32    lane-dense padded logits
    """
    B, S = mask_ref.shape
    BS = B * S
    VP, H = wemb_ref.shape
    H2, H3, H4 = 2 * H, 3 * H, 4 * H

    vec = vec_ref[...]      # (VEC_ROWS, 128) -- one load, static slices after
    wmat = wmat_ref[...]    # (H, WMAT_COLS)

    def row(r, width):
        return vec[r:r + 1, :width]                      # (1, width)

    def layernorm(x, g, b):
        mean = jnp.mean(x, axis=-1, keepdims=True)
        var = jnp.mean(jnp.square(x - mean), axis=-1, keepdims=True)
        return (x - mean) * jax.lax.rsqrt(var + LN_EPS) * g + b

    # ---- embeddings: gather as one-hot matmul (MXU is idle at these shapes) ----
    ids = ids_ref[...]                                               # (BS, 1)
    vocab_iota = jax.lax.broadcasted_iota(jnp.int32, (BS, VP), 1)
    onehot = (vocab_iota == ids).astype(jnp.float32)                 # (BS, VP)
    emb = jnp.dot(onehot, wemb_ref[...], preferred_element_type=jnp.float32)  # (BS,H)
    pos = vec[R_POS:R_POS + S, :H]                                   # (S, H)
    emb = (emb.reshape(B, S, H) + pos[None, :, :]).reshape(BS, H)    # broadcast add
    x = layernorm(emb, row(R_EMB_G, H), row(R_EMB_B, H))             # (BS, H)

    # ---- fused Q/K/V projection: one lane-dense matmul for the whole batch ----
    qkv = jnp.dot(x, wmat[:, :H3], preferred_element_type=jnp.float32) \
        + row(R_BQKV, H3)                                            # (BS, 3H)

    # CLS rows only feed the rest of the network (only last_hidden[:,0,:] is used)
    x_cls = x.reshape(B, S, H)[:, 0, :]                              # (B, H)
    q_cls = qkv.reshape(B, S, H3)[:, 0, :H]                          # (B, H), scale folded in

    # ---- attention for the CLS query only (VPU multiply+reduce per head) ----
    bias = (1.0 - mask_ref[...]) * -1e9                              # (B, S), broadcast later
    ctx_heads = []
    for h in range(NUM_HEADS):
        q_h = q_cls[:, h * HEAD_DIM:(h + 1) * HEAD_DIM]              # (B, HD)
        k_h = qkv[:, H + h * HEAD_DIM:H + (h + 1) * HEAD_DIM].reshape(B, S, HEAD_DIM)
        v_h = qkv[:, H2 + h * HEAD_DIM:H2 + (h + 1) * HEAD_DIM].reshape(B, S, HEAD_DIM)
        scores = jnp.sum(q_h[:, None, :] * k_h, axis=-1) + bias      # (B, S)
        m = jnp.max(scores, axis=-1, keepdims=True)
        p = jnp.exp(scores - m)
        p = p * pl.reciprocal(jnp.sum(p, axis=-1, keepdims=True), approx=True)
        ctx_heads.append(jnp.sum(p[:, :, None] * v_h, axis=1))       # (B, HD)
    ctx = jnp.concatenate(ctx_heads, axis=-1)                        # (B, H)

    # ---- attention output projection + residual + LN (CLS rows only) ----
    attn = jnp.dot(ctx, wmat[:, H3:H4], preferred_element_type=jnp.float32) + row(R_BO, H)
    h1 = layernorm(x_cls + attn, row(R_LN1_G, H), row(R_LN1_B, H))   # (B, H)

    # ---- feed-forward (CLS rows only) ----
    ff = jnp.dot(h1, wmat[:, H4:H4 + INTER],
                 preferred_element_type=jnp.float32) + row(R_B1, INTER)
    ff = jax.nn.gelu(ff, approximate=True)  # TODO(synk): HF BERT default is exact erf gelu
    ff = jnp.dot(ff, w2_ref[...], preferred_element_type=jnp.float32) + row(R_B2, H)
    h2 = layernorm(h1 + ff, row(R_LN2_G, H), row(R_LN2_B, H))        # (B, H) == CLS hidden

    # ---- classification head: fc1 -> ReLU -> fc2, lane-dense output ----
    hfc = jnp.dot(h2, wmat[:, H4 + INTER:H4 + INTER + FC1_OUT],
                  preferred_element_type=jnp.float32) + row(R_FC1_B, FC1_OUT)
    hfc = jnp.maximum(hfc, 0.0)
    logits = jnp.dot(hfc, fc2w_ref[...], preferred_element_type=jnp.float32) \
        + row(R_FC2_B, OUT_LANES)
    out_ref[...] = logits.astype(out_ref.dtype)                      # (B, 128)


# ======================= wrapper ==========================================

@jax.jit
def classifier_forward(input_ids, attention_mask, params):
    """Full forward pass matching Classifier.forward semantics -> (B, NUM_CLASSES)."""
    B, S = input_ids.shape
    ids2 = input_ids.reshape(B * S, 1).astype(jnp.int32)
    mask_f = attention_mask.astype(jnp.float32)
    p = params
    cost = pl.CostEstimate(flops=340_000, transcendentals=400, bytes_accessed=150_000)
    padded = pl.pallas_call(
        classifier_fused_kernel,
        out_shape=jax.ShapeDtypeStruct((B, OUT_LANES), jnp.float32),
        cost_estimate=cost,
    )(ids2, mask_f, p["wemb"], p["wmat"], p["w2"], p["fc2_w"], p["vec"])
    return padded[:, :NUM_CLASSES]


# ======================= deterministic parameter init =====================

def _prepare_params(raw):
    """One-time wrapper-side re-layout of raw BERT-style weights into the
    packed kernel layout (fused QKV/wo/w1/fc1 weight slab + packed bias rows)."""
    scale = 1.0 / math.sqrt(HEAD_DIM)   # softmax scale folded into Q weights/bias

    wmat = jnp.concatenate(
        [raw["wq"] * scale, raw["wk"], raw["wv"], raw["wo"], raw["w1"], raw["fc1_w"]],
        axis=1)                                                       # (H, WMAT_COLS)
    assert wmat.shape == (HIDDEN, WMAT_COLS)

    wemb = jnp.zeros((VOCAB_PAD, HIDDEN), jnp.float32).at[:VOCAB].set(raw["word_emb"])
    fc2w = jnp.zeros((FC1_OUT, OUT_LANES), jnp.float32).at[:, :NUM_CLASSES].set(raw["fc2_w"])

    vec = jnp.zeros((VEC_ROWS, 128), jnp.float32)

    def put(v_, r, x):
        x = x.reshape(-1)
        return v_.at[r, :x.shape[0]].set(x)

    vec = put(vec, R_EMB_G, raw["emb_ln_g"])
    vec = put(vec, R_EMB_B, raw["emb_ln_b"])
    vec = put(vec, R_BQKV,
              jnp.concatenate([raw["bq"] * scale, raw["bk"], raw["bv"]], axis=1))
    vec = put(vec, R_BO, raw["bo"])
    vec = put(vec, R_LN1_G, raw["ln1_g"])
    vec = put(vec, R_LN1_B, raw["ln1_b"])
    vec = put(vec, R_B1, raw["b1"])
    vec = put(vec, R_B2, raw["b2"])
    vec = put(vec, R_LN2_G, raw["ln2_g"])
    vec = put(vec, R_LN2_B, raw["ln2_b"])
    vec = put(vec, R_FC1_B, raw["fc1_b"])
    vec = put(vec, R_FC2_B,
              jnp.zeros((1, OUT_LANES), jnp.float32).at[:, :NUM_CLASSES].set(raw["fc2_b"]))
    vec = vec.at[R_POS:R_POS + SEQ, :HIDDEN].set(raw["pos_emb"])

    return {"wemb": wemb, "wmat": wmat, "w2": raw["w2"], "fc2_w": fc2w, "vec": vec}


def init_params(key):
    ks = jax.random.split(key, 10)
    std = 0.02
    n = lambda k, shp: jax.random.normal(k, shp, jnp.float32) * std
    raw = {
        "word_emb": n(ks[0], (VOCAB, HIDDEN)),
        "pos_emb": n(ks[1], (SEQ, HIDDEN)),
        "emb_ln_g": jnp.ones((1, HIDDEN), jnp.float32),
        "emb_ln_b": jnp.zeros((1, HIDDEN), jnp.float32),
        "wq": n(ks[2], (HIDDEN, HIDDEN)), "bq": jnp.zeros((1, HIDDEN), jnp.float32),
        "wk": n(ks[3], (HIDDEN, HIDDEN)), "bk": jnp.zeros((1, HIDDEN), jnp.float32),
        "wv": n(ks[4], (HIDDEN, HIDDEN)), "bv": jnp.zeros((1, HIDDEN), jnp.float32),
        "wo": n(ks[5], (HIDDEN, HIDDEN)), "bo": jnp.zeros((1, HIDDEN), jnp.float32),
        "ln1_g": jnp.ones((1, HIDDEN), jnp.float32),
        "ln1_b": jnp.zeros((1, HIDDEN), jnp.float32),
        "w1": n(ks[6], (HIDDEN, INTER)), "b1": jnp.zeros((1, INTER), jnp.float32),
        "w2": n(ks[7], (INTER, HIDDEN)), "b2": jnp.zeros((1, HIDDEN), jnp.float32),
        "ln2_g": jnp.ones((1, HIDDEN), jnp.float32),
        "ln2_b": jnp.zeros((1, HIDDEN), jnp.float32),
        # classification head (same shapes as nn.Linear(H,128), nn.Linear(128,3))
        "fc1_w": n(ks[8], (HIDDEN, FC1_OUT)), "fc1_b": jnp.zeros((1, FC1_OUT), jnp.float32),
        "fc2_w": n(ks[9], (FC1_OUT, NUM_CLASSES)),
        "fc2_b": jnp.zeros((1, NUM_CLASSES), jnp.float32),
    }
    return _prepare_params(raw)


# ======================= main =============================================

if __name__ == "__main__":
    key = jax.random.PRNGKey(0)
    pkey, dkey = jax.random.split(key)
    params = init_params(pkey)

    B = 2
    input_ids = jax.random.randint(dkey, (B, SEQ), 0, VOCAB, dtype=jnp.int32)
    # first 6 tokens real, last 2 padded (exercises the attention mask)
    attention_mask = jnp.concatenate(
        [jnp.ones((B, 6), jnp.int32), jnp.zeros((B, SEQ - 6), jnp.int32)], axis=1)

    logits = classifier_forward(input_ids, attention_mask, params)
    jax.block_until_ready(logits)
    assert logits.shape == (B, NUM_CLASSES)
    assert bool(jnp.all(jnp.isfinite(logits)))
    print("KERNEL_OK")
</pallas_src>

<mosaic_0001>
module attributes {stable_mosaic.version = 11 : i64} {
  func.func @classifier_fused_kernel(%arg0: memref<16x1xi32, #tpu.memory_space<vmem>>, %arg1: memref<2x8xf32, #tpu.memory_space<vmem>>, %arg2: memref<128x32xf32, #tpu.memory_space<vmem>>, %arg3: memref<32x320xf32, #tpu.memory_space<vmem>>, %arg4: memref<64x32xf32, #tpu.memory_space<vmem>>, %arg5: memref<128x128xf32, #tpu.memory_space<vmem>>, %arg6: memref<24x128xf32, #tpu.memory_space<vmem>>, %arg7: memref<2x128xf32, #tpu.memory_space<vmem>>) attributes {dimension_semantics = [], scalar_prefetch = 0 : i64, scratch_operands = 0 : i64, tpu.core_type = #tpu.core_type<tc>} {
    %c0 = arith.constant 0 : index
    %c0_0 = arith.constant 0 : index
    %0 = vector.load %arg6[%c0, %c0_0] : memref<24x128xf32, #tpu.memory_space<vmem>>, vector<24x128xf32>
    %c0_1 = arith.constant 0 : index
    %c0_2 = arith.constant 0 : index
    %1 = vector.load %arg3[%c0_1, %c0_2] : memref<32x320xf32, #tpu.memory_space<vmem>>, vector<32x320xf32>
    %c0_3 = arith.constant 0 : index
    %c0_4 = arith.constant 0 : index
    %2 = vector.load %arg0[%c0_3, %c0_4] : memref<16x1xi32, #tpu.memory_space<vmem>>, vector<16x1xi32>
    %3 = tpu.iota {dimensions = array<i32: 1>} : vector<16x128xi32>
    %4 = vector.broadcast %2 : vector<16x1xi32> to vector<16x128xi32>
    %5 = arith.cmpi eq, %3, %4 : vector<16x128xi32>
    %6 = arith.extui %5 : vector<16x128xi1> to vector<16x128xi32>
    %7 = arith.sitofp %6 : vector<16x128xi32> to vector<16x128xf32>
    %c0_5 = arith.constant 0 : index
    %c0_6 = arith.constant 0 : index
    %8 = vector.load %arg2[%c0_5, %c0_6] : memref<128x32xf32, #tpu.memory_space<vmem>>, vector<128x32xf32>
    %cst = arith.constant dense<0.000000e+00> : vector<16x32xf32>
    %9 = tpu.matmul %7, %8, %cst {dimension_numbers = #tpu.dot_dimension_numbers<[1], [0], [0], [1], [0, 0, 1, 1], [], []>} : vector<16x128xf32>, vector<128x32xf32>, vector<16x32xf32> -> vector<16x32xf32>
    %10 = vector.extract_strided_slice %0 {offsets = [16, 0], sizes = [8, 32], strides = [1, 1]} : vector<24x128xf32> to vector<8x32xf32>
    %11 = vector.shape_cast %9 : vector<16x32xf32> to vector<2x8x32xf32>
    %12 = vector.shape_cast %10 : vector<8x32xf32> to vector<1x8x32xf32>
    %13 = vector.broadcast %12 : vector<1x8x32xf32> to vector<2x8x32xf32>
    %14 = arith.addf %11, %13 : vector<2x8x32xf32>
    %15 = vector.shape_cast %14 : vector<2x8x32xf32> to vector<16x32xf32>
    %16 = vector.extract_strided_slice %0 {offsets = [0, 0], sizes = [1, 32], strides = [1, 1]} : vector<24x128xf32> to vector<1x32xf32>
    %17 = vector.extract_strided_slice %0 {offsets = [1, 0], sizes = [1, 32], strides = [1, 1]} : vector<24x128xf32> to vector<1x32xf32>
    %cst_7 = arith.constant dense<0.000000e+00> : vector<16xf32>
    %18 = vector.multi_reduction <add>, %15, %cst_7 [1] : vector<16x32xf32> to vector<16xf32>
    %19 = vector.shape_cast %18 : vector<16xf32> to vector<16x1xf32>
    %cst_8 = arith.constant 3.200000e+01 : f32
    %20 = vector.broadcast %cst_8 : f32 to vector<16x1xf32>
    %21 = arith.divf %19, %20 : vector<16x1xf32>
    %22 = vector.broadcast %21 : vector<16x1xf32> to vector<16x32xf32>
    %23 = arith.subf %15, %22 : vector<16x32xf32>
    %24 = arith.mulf %23, %23 : vector<16x32xf32>
    %cst_9 = arith.constant dense<0.000000e+00> : vector<16xf32>
    %25 = vector.multi_reduction <add>, %24, %cst_9 [1] : vector<16x32xf32> to vector<16xf32>
    %26 = vector.shape_cast %25 : vector<16xf32> to vector<16x1xf32>
    %cst_10 = arith.constant 3.200000e+01 : f32
    %27 = vector.broadcast %cst_10 : f32 to vector<16x1xf32>
    %28 = arith.divf %26, %27 : vector<16x1xf32>
    %29 = vector.broadcast %21 : vector<16x1xf32> to vector<16x32xf32>
    %30 = arith.subf %15, %29 : vector<16x32xf32>
    %cst_11 = arith.constant 9.99999996E-13 : f32
    %31 = vector.broadcast %cst_11 : f32 to vector<16x1xf32>
    %32 = arith.addf %28, %31 : vector<16x1xf32>
    %33 = math.rsqrt %32 : vector<16x1xf32>
    %34 = vector.broadcast %33 : vector<16x1xf32> to vector<16x32xf32>
    %35 = arith.mulf %30, %34 : vector<16x32xf32>
    %36 = vector.broadcast %16 : vector<1x32xf32> to vector<16x32xf32>
    %37 = arith.mulf %35, %36 : vector<16x32xf32>
    %38 = vector.broadcast %17 : vector<1x32xf32> to vector<16x32xf32>
    %39 = arith.addf %37, %38 : vector<16x32xf32>
    %40 = vector.extract_strided_slice %1 {offsets = [0, 0], sizes = [32, 96], strides = [1, 1]} : vector<32x320xf32> to vector<32x96xf32>
    %cst_12 = arith.constant dense<0.000000e+00> : vector<16x96xf32>
    %41 = tpu.matmul %39, %40, %cst_12 {dimension_numbers = #tpu.dot_dimension_numbers<[1], [0], [0], [1], [0, 0, 1, 1], [], []>} : vector<16x32xf32>, vector<32x96xf32>, vector<16x96xf32> -> vector<16x96xf32>
    %42 = vector.extract_strided_slice %0 {offsets = [2, 0], sizes = [1, 96], strides = [1, 1]} : vector<24x128xf32> to vector<1x96xf32>
    %43 = vector.broadcast %42 : vector<1x96xf32> to vector<16x96xf32>
    %44 = arith.addf %41, %43 : vector<16x96xf32>
    %45 = vector.shape_cast %39 : vector<16x32xf32> to vector<2x8x32xf32>
    %46 = vector.extract_strided_slice %45 {offsets = [0, 0, 0], sizes = [2, 1, 32], strides = [1, 1, 1]} : vector<2x8x32xf32> to vector<2x1x32xf32>
    %47 = vector.shape_cast %46 : vector<2x1x32xf32> to vector<2x32xf32>
    %48 = vector.shape_cast %44 : vector<16x96xf32> to vector<2x8x96xf32>
    %49 = vector.extract_strided_slice %48 {offsets = [0, 0, 0], sizes = [2, 1, 32], strides = [1, 1, 1]} : vector<2x8x96xf32> to vector<2x1x32xf32>
    %50 = vector.shape_cast %49 : vector<2x1x32xf32> to vector<2x32xf32>
    %c0_13 = arith.constant 0 : index
    %c0_14 = arith.constant 0 : index
    %51 = vector.load %arg1[%c0_13, %c0_14] : memref<2x8xf32, #tpu.memory_space<vmem>>, vector<2x8xf32>
    %cst_15 = arith.constant 1.000000e+00 : f32
    %52 = vector.broadcast %cst_15 : f32 to vector<2x8xf32>
    %53 = arith.subf %52, %51 : vector<2x8xf32>
    %cst_16 = arith.constant -1.000000e+09 : f32
    %54 = vector.broadcast %cst_16 : f32 to vector<2x8xf32>
    %55 = arith.mulf %53, %54 : vector<2x8xf32>
    %56 = vector.extract_strided_slice %50 {offsets = [0, 0], sizes = [2, 16], strides = [1, 1]} : vector<2x32xf32> to vector<2x16xf32>
    %57 = vector.extract_strided_slice %44 {offsets = [0, 32], sizes = [16, 16], strides = [1, 1]} : vector<16x96xf32> to vector<16x16xf32>
    %58 = vector.shape_cast %57 : vector<16x16xf32> to vector<2x8x16xf32>
    %59 = vector.extract_strided_slice %44 {offsets = [0, 64], sizes = [16, 16], strides = [1, 1]} : vector<16x96xf32> to vector<16x16xf32>
    %60 = vector.shape_cast %59 : vector<16x16xf32> to vector<2x8x16xf32>
    %61 = vector.shape_cast %56 : vector<2x16xf32> to vector<2x1x16xf32>
    %62 = vector.broadcast %61 : vector<2x1x16xf32> to vector<2x8x16xf32>
    %63 = arith.mulf %62, %58 : vector<2x8x16xf32>
    %cst_17 = arith.constant dense<0.000000e+00> : vector<2x8xf32>
    %64 = vector.multi_reduction <add>, %63, %cst_17 [2] : vector<2x8x16xf32> to vector<2x8xf32>
    %65 = arith.addf %64, %55 : vector<2x8xf32>
    %cst_18 = arith.constant dense<0xFF800000> : vector<2xf32>
    %66 = vector.multi_reduction <maximumf>, %65, %cst_18 [1] : vector<2x8xf32> to vector<2xf32>
    %67 = vector.shape_cast %66 : vector<2xf32> to vector<2x1xf32>
    %68 = vector.broadcast %67 : vector<2x1xf32> to vector<2x8xf32>
    %69 = arith.subf %65, %68 : vector<2x8xf32>
    %70 = math.exp %69 : vector<2x8xf32>
    %cst_19 = arith.constant dense<0.000000e+00> : vector<2xf32>
    %71 = vector.multi_reduction <add>, %70, %cst_19 [1] : vector<2x8xf32> to vector<2xf32>
    %72 = vector.shape_cast %71 : vector<2xf32> to vector<2x1xf32>
    %73 = tpu.reciprocal %72 {approx = true} : vector<2x1xf32> -> vector<2x1xf32>
    %74 = vector.broadcast %73 : vector<2x1xf32> to vector<2x8xf32>
    %75 = arith.mulf %70, %74 : vector<2x8xf32>
    %76 = vector.shape_cast %75 : vector<2x8xf32> to vector<2x8x1xf32>
    %77 = vector.broadcast %76 : vector<2x8x1xf32> to vector<2x8x16xf32>
    %78 = arith.mulf %77, %60 : vector<2x8x16xf32>
    %cst_20 = arith.constant dense<0.000000e+00> : vector<2x16xf32>
    %79 = vector.multi_reduction <add>, %78, %cst_20 [1] : vector<2x8x16xf32> to vector<2x16xf32>
    %80 = vector.extract_strided_slice %50 {offsets = [0, 16], sizes = [2, 16], strides = [1, 1]} : vector<2x32xf32> to vector<2x16xf32>
    %81 = vector.extract_strided_slice %44 {offsets = [0, 48], sizes = [16, 16], strides = [1, 1]} : vector<16x96xf32> to vector<16x16xf32>
    %82 = vector.shape_cast %81 : vector<16x16xf32> to vector<2x8x16xf32>
    %83 = vector.extract_strided_slice %44 {offsets = [0, 80], sizes = [16, 16], strides = [1, 1]} : vector<16x96xf32> to vector<16x16xf32>
    %84 = vector.shape_cast %83 : vector<16x16xf32> to vector<2x8x16xf32>
    %85 = vector.shape_cast %80 : vector<2x16xf32> to vector<2x1x16xf32>
    %86 = vector.broadcast %85 : vector<2x1x16xf32> to vector<2x8x16xf32>
    %87 = arith.mulf %86, %82 : vector<2x8x16xf32>
    %cst_21 = arith.constant dense<0.000000e+00> : vector<2x8xf32>
    %88 = vector.multi_reduction <add>, %87, %cst_21 [2] : vector<2x8x16xf32> to vector<2x8xf32>
    %89 = arith.addf %88, %55 : vector<2x8xf32>
    %cst_22 = arith.constant dense<0xFF800000> : vector<2xf32>
    %90 = vector.multi_reduction <maximumf>, %89, %cst_22 [1] : vector<2x8xf32> to vector<2xf32>
    %91 = vector.shape_cast %90 : vector<2xf32> to vector<2x1xf32>
    %92 = vector.broadcast %91 : vector<2x1xf32> to vector<2x8xf32>
    %93 = arith.subf %89, %92 : vector<2x8xf32>
    %94 = math.exp %93 : vector<2x8xf32>
    %cst_23 = arith.constant dense<0.000000e+00> : vector<2xf32>
    %95 = vector.multi_reduction <add>, %94, %cst_23 [1] : vector<2x8xf32> to vector<2xf32>
    %96 = vector.shape_cast %95 : vector<2xf32> to vector<2x1xf32>
    %97 = tpu.reciprocal %96 {approx = true} : vector<2x1xf32> -> vector<2x1xf32>
    %98 = vector.broadcast %97 : vector<2x1xf32> to vector<2x8xf32>
    %99 = arith.mulf %94, %98 : vector<2x8xf32>
    %100 = vector.shape_cast %99 : vector<2x8xf32> to vector<2x8x1xf32>
    %101 = vector.broadcast %100 : vector<2x8x1xf32> to vector<2x8x16xf32>
    %102 = arith.mulf %101, %84 : vector<2x8x16xf32>
    %cst_24 = arith.constant dense<0.000000e+00> : vector<2x16xf32>
    %103 = vector.multi_reduction <add>, %102, %cst_24 [1] : vector<2x8x16xf32> to vector<2x16xf32>
    %104 = tpu.concatenate %79, %103 in 1 : vector<2x16xf32>, vector<2x16xf32> -> vector<2x32xf32>
    %105 = vector.extract_strided_slice %1 {offsets = [0, 96], sizes = [32, 32], strides = [1, 1]} : vector<32x320xf32> to vector<32x32xf32>
    %cst_25 = arith.constant dense<0.000000e+00> : vector<2x32xf32>
    %106 = tpu.matmul %104, %105, %cst_25 {dimension_numbers = #tpu.dot_dimension_numbers<[1], [0], [0], [1], [0, 0, 1, 1], [], []>} : vector<2x32xf32>, vector<32x32xf32>, vector<2x32xf32> -> vector<2x32xf32>
    %107 = vector.extract_strided_slice %0 {offsets = [3, 0], sizes = [1, 32], strides = [1, 1]} : vector<24x128xf32> to vector<1x32xf32>
    %108 = vector.broadcast %107 : vector<1x32xf32> to vector<2x32xf32>
    %109 = arith.addf %106, %108 : vector<2x32xf32>
    %110 = arith.addf %47, %109 : vector<2x32xf32>
    %111 = vector.extract_strided_slice %0 {offsets = [4, 0], sizes = [1, 32], strides = [1, 1]} : vector<24x128xf32> to vector<1x32xf32>
    %112 = vector.extract_strided_slice %0 {offsets = [5, 0], sizes = [1, 32], strides = [1, 1]} : vector<24x128xf32> to vector<1x32xf32>
    %cst_26 = arith.constant dense<0.000000e+00> : vector<2xf32>
    %113 = vector.multi_reduction <add>, %110, %cst_26 [1] : vector<2x32xf32> to vector<2xf32>
    %114 = vector.shape_cast %113 : vector<2xf32> to vector<2x1xf32>
    %cst_27 = arith.constant 3.200000e+01 : f32
    %115 = vector.broadcast %cst_27 : f32 to vector<2x1xf32>
    %116 = arith.divf %114, %115 : vector<2x1xf32>
    %117 = vector.broadcast %116 : vector<2x1xf32> to vector<2x32xf32>
    %118 = arith.subf %110, %117 : vector<2x32xf32>
    %119 = arith.mulf %118, %118 : vector<2x32xf32>
    %cst_28 = arith.constant dense<0.000000e+00> : vector<2xf32>
    %120 = vector.multi_reduction <add>, %119, %cst_28 [1] : vector<2x32xf32> to vector<2xf32>
    %121 = vector.shape_cast %120 : vector<2xf32> to vector<2x1xf32>
    %cst_29 = arith.constant 3.200000e+01 : f32
    %122 = vector.broadcast %cst_29 : f32 to vector<2x1xf32>
    %123 = arith.divf %121, %122 : vector<2x1xf32>
    %124 = vector.broadcast %116 : vector<2x1xf32> to vector<2x32xf32>
    %125 = arith.subf %110, %124 : vector<2x32xf32>
    %cst_30 = arith.constant 9.99999996E-13 : f32
    %126 = vector.broadcast %cst_30 : f32 to vector<2x1xf32>
    %127 = arith.addf %123, %126 : vector<2x1xf32>
    %128 = math.rsqrt %127 : vector<2x1xf32>
    %129 = vector.broadcast %128 : vector<2x1xf32> to vector<2x32xf32>
    %130 = arith.mulf %125, %129 : vector<2x32xf32>
    %131 = vector.broadcast %111 : vector<1x32xf32> to vector<2x32xf32>
    %132 = arith.mulf %130, %131 : vector<2x32xf32>
    %133 = vector.broadcast %112 : vector<1x32xf32> to vector<2x32xf32>
    %134 = arith.addf %132, %133 : vector<2x32xf32>
    %135 = vector.extract_strided_slice %1 {offsets = [0, 128], sizes = [32, 64], strides = [1, 1]} : vector<32x320xf32> to vector<32x64xf32>
    %cst_31 = arith.constant dense<0.000000e+00> : vector<2x64xf32>
    %136 = tpu.matmul %134, %135, %cst_31 {dimension_numbers = #tpu.dot_dimension_numbers<[1], [0], [0], [1], [0, 0, 1, 1], [], []>} : vector<2x32xf32>, vector<32x64xf32>, vector<2x64xf32> -> vector<2x64xf32>
    %137 = vector.extract_strided_slice %0 {offsets = [6, 0], sizes = [1, 64], strides = [1, 1]} : vector<24x128xf32> to vector<1x64xf32>
    %138 = vector.broadcast %137 : vector<1x64xf32> to vector<2x64xf32>
    %139 = arith.addf %136, %138 : vector<2x64xf32>
    %140 = arith.mulf %139, %139 : vector<2x64xf32>
    %141 = arith.mulf %139, %140 : vector<2x64xf32>
    %cst_32 = arith.constant 4.471500e-02 : f32
    %142 = vector.broadcast %cst_32 : f32 to vector<2x64xf32>
    %143 = arith.mulf %142, %141 : vector<2x64xf32>
    %144 = arith.addf %139, %143 : vector<2x64xf32>
    %cst_33 = arith.constant 0.797884583 : f32
    %145 = vector.broadcast %cst_33 : f32 to vector<2x64xf32>
    %146 = arith.mulf %145, %144 : vector<2x64xf32>
    %147 = math.tanh %146 : vector<2x64xf32>
    %cst_34 = arith.constant 1.000000e+00 : f32
    %148 = vector.broadcast %cst_34 : f32 to vector<2x64xf32>
    %149 = arith.addf %148, %147 : vector<2x64xf32>
    %cst_35 = arith.constant 5.000000e-01 : f32
    %150 = vector.broadcast %cst_35 : f32 to vector<2x64xf32>
    %151 = arith.mulf %150, %149 : vector<2x64xf32>
    %152 = arith.mulf %139, %151 : vector<2x64xf32>
    %c0_36 = arith.constant 0 : index
    %c0_37 = arith.constant 0 : index
    %153 = vector.load %arg4[%c0_36, %c0_37] : memref<64x32xf32, #tpu.memory_space<vmem>>, vector<64x32xf32>
    %cst_38 = arith.constant dense<0.000000e+00> : vector<2x32xf32>
    %154 = tpu.matmul %152, %153, %cst_38 {dimension_numbers = #tpu.dot_dimension_numbers<[1], [0], [0], [1], [0, 0, 1, 1], [], []>} : vector<2x64xf32>, vector<64x32xf32>, vector<2x32xf32> -> vector<2x32xf32>
    %155 = vector.extract_strided_slice %0 {offsets = [7, 0], sizes = [1, 32], strides = [1, 1]} : vector<24x128xf32> to vector<1x32xf32>
    %156 = vector.broadcast %155 : vector<1x32xf32> to vector<2x32xf32>
    %157 = arith.addf %154, %156 : vector<2x32xf32>
    %158 = arith.addf %134, %157 : vector<2x32xf32>
    %159 = vector.extract_strided_slice %0 {offsets = [8, 0], sizes = [1, 32], strides = [1, 1]} : vector<24x128xf32> to vector<1x32xf32>
    %160 = vector.extract_strided_slice %0 {offsets = [9, 0], sizes = [1, 32], strides = [1, 1]} : vector<24x128xf32> to vector<1x32xf32>
    %cst_39 = arith.constant dense<0.000000e+00> : vector<2xf32>
    %161 = vector.multi_reduction <add>, %158, %cst_39 [1] : vector<2x32xf32> to vector<2xf32>
    %162 = vector.shape_cast %161 : vector<2xf32> to vector<2x1xf32>
    %cst_40 = arith.constant 3.200000e+01 : f32
    %163 = vector.broadcast %cst_40 : f32 to vector<2x1xf32>
    %164 = arith.divf %162, %163 : vector<2x1xf32>
    %165 = vector.broadcast %164 : vector<2x1xf32> to vector<2x32xf32>
    %166 = arith.subf %158, %165 : vector<2x32xf32>
    %167 = arith.mulf %166, %166 : vector<2x32xf32>
    %cst_41 = arith.constant dense<0.000000e+00> : vector<2xf32>
    %168 = vector.multi_reduction <add>, %167, %cst_41 [1] : vector<2x32xf32> to vector<2xf32>
    %169 = vector.shape_cast %168 : vector<2xf32> to vector<2x1xf32>
    %cst_42 = arith.constant 3.200000e+01 : f32
    %170 = vector.broadcast %cst_42 : f32 to vector<2x1xf32>
    %171 = arith.divf %169, %170 : vector<2x1xf32>
    %172 = vector.broadcast %164 : vector<2x1xf32> to vector<2x32xf32>
    %173 = arith.subf %158, %172 : vector<2x32xf32>
    %cst_43 = arith.constant 9.99999996E-13 : f32
    %174 = vector.broadcast %cst_43 : f32 to vector<2x1xf32>
    %175 = arith.addf %171, %174 : vector<2x1xf32>
    %176 = math.rsqrt %175 : vector<2x1xf32>
    %177 = vector.broadcast %176 : vector<2x1xf32> to vector<2x32xf32>
    %178 = arith.mulf %173, %177 : vector<2x32xf32>
    %179 = vector.broadcast %159 : vector<1x32xf32> to vector<2x32xf32>
    %180 = arith.mulf %178, %179 : vector<2x32xf32>
    %181 = vector.broadcast %160 : vector<1x32xf32> to vector<2x32xf32>
    %182 = arith.addf %180, %181 : vector<2x32xf32>
    %183 = vector.extract_strided_slice %1 {offsets = [0, 192], sizes = [32, 128], strides = [1, 1]} : vector<32x320xf32> to vector<32x128xf32>
    %cst_44 = arith.constant dense<0.000000e+00> : vector<2x128xf32>
    %184 = tpu.matmul %182, %183, %cst_44 {dimension_numbers = #tpu.dot_dimension_numbers<[1], [0], [0], [1], [0, 0, 1, 1], [], []>} : vector<2x32xf32>, vector<32x128xf32>, vector<2x128xf32> -> vector<2x128xf32>
    %185 = vector.extract_strided_slice %0 {offsets = [10, 0], sizes = [1, 128], strides = [1, 1]} : vector<24x128xf32> to vector<1x128xf32>
    %186 = vector.broadcast %185 : vector<1x128xf32> to vector<2x128xf32>
    %187 = arith.addf %184, %186 : vector<2x128xf32>
    %cst_45 = arith.constant 0.000000e+00 : f32
    %188 = vector.broadcast %cst_45 : f32 to vector<2x128xf32>
    %189 = arith.maximumf %187, %188 : vector<2x128xf32>
    %c0_46 = arith.constant 0 : index
    %c0_47 = arith.constant 0 : index
    %190 = vector.load %arg5[%c0_46, %c0_47] : memref<128x128xf32, #tpu.memory_space<vmem>>, vector<128x128xf32>
    %cst_48 = arith.constant dense<0.000000e+00> : vector<2x128xf32>
    %191 = tpu.matmul %189, %190, %cst_48 {dimension_numbers = #tpu.dot_dimension_numbers<[1], [0], [0], [1], [0, 0, 1, 1], [], []>} : vector<2x128xf32>, vector<128x128xf32>, vector<2x128xf32> -> vector<2x128xf32>
    %192 = vector.extract_strided_slice %0 {offsets = [11, 0], sizes = [1, 128], strides = [1, 1]} : vector<24x128xf32> to vector<1x128xf32>
    %193 = vector.broadcast %192 : vector<1x128xf32> to vector<2x128xf32>
    %194 = arith.addf %191, %193 : vector<2x128xf32>
    %c0_49 = arith.constant 0 : index
    %c0_50 = arith.constant 0 : index
    %195 = vector.load %arg7[%c0_49, %c0_50] : memref<2x128xf32, #tpu.memory_space<vmem>>, vector<2x128xf32>
    tpu.vector_store %arg7[%c0_49, %c0_50], %194 {strides = array<i32>} : memref<2x128xf32, #tpu.memory_space<vmem>>, vector<2x128xf32>,
    return
  }
}

</mosaic_0001>

<bundles_post_ra>
// kernel: classifier_forward.1
= control target key start
LH: loop header
LB: loop body
LE: loop exit
PB: predicated region body
PF: predicated region fallthrough
CT: control target
= control target key end

     0   :  { %12 = vsyncpa [#allocation3], 0  ;;  %s2011_s0 = inlined_call_operand.vmem [shape: s32[16,1], index: 0, kind: input, shape index: {}]   ;;  %s2012_s1 = inlined_call_operand.vmem [shape: f32[2,8], index: 1, kind: input, shape index: {}]   ;;  %s2013_s2 = inlined_call_operand.vmem [shape: f32[128,32], index: 2, kind: input, shape index: {}]   ;;  %s2014_s3 = inlined_call_operand.vmem [shape: f32[32,320], index: 3, kind: input, shape index: {}]   ;;  %s2015_s4 = inlined_call_operand.vmem [shape: f32[64,32], index: 4, kind: input, shape index: {}]   ;;  %s2016_s5 = inlined_call_operand.vmem [shape: f32[128,128], index: 5, kind: input, shape index: {}]   ;;  %s2017_s6 = inlined_call_operand.hbm [shape: f32[24,128], index: 6, kind: input, shape index: {}]   ;;  %s2018_s7 = inlined_call_operand.hbm [shape: f32[2,128], index: 7, kind: output, shape index: {}]  }
   0x1   :  { %13 = vsyncpa [#allocation4], 0  ;;  %s1577_s24 = smov [#allocation2]   ;;  %s1529_s28 = scalar_lea.hbm %s2017_s6, 384 }
   0x2   :  { %s31_s25 = sshll.u32 %s1577_s24, 4  ;;  %p1530_p0 = scmp.ne.s32.totalorder %s2017_s6, %s1529_s28  ;;  %s32_s25 = int_to_ptr.vmem [resolvable:$true] %s31_s25 }
   0x3   :  { %p1533_p1 = scmp.lt.u32.totalorder %s1529_s28, %s2017_s6 }
   0x5   :  { %p1535_p2 = pnand %p1533_p1, %p1530_p0 }
   0x7   :  { %1538 = shalt.err (!%p1535_p2)
}
   0x8   :  { %s1539_s10 = scalar_lea.vmem %s32_s25, 384  ;;  %p1544_p4 = scmp.lt.s32.totalorder %s32_s25, %s32_s25 }
   0x9   :  { %p1540_p3 = scmp.ne.s32.totalorder %s32_s25, %s1539_s10  ;;  %p1545_p5 = scmp.lt.s32.totalorder %s1539_s10, %s1539_s10 }
   0xb   :  { %p1546_p6 = por %p1545_p5, %p1544_p4 }
   0xd   :  { %p1547_p7 = pnand %p1546_p6, %p1540_p3 }
   0xf   :  { %1550 = shalt.err (!%p1547_p7)
}
  0x10   :  { %s1578_s11 = smov 128   ;;  %s1579_s12 = smov 8  }
  0x11   :  { %37 = dma.hbm_to_vmem [thread:$0]  %s2017_s6, 384, %s32_s25, [#allocation3], %s1578_s11, %s1578_s11, %s1579_s12  }
  0x12   :  { %1573 = dma.done.wait [#allocation3], 384  }
  0x13   :  { %1574 = vsyncadd [#allocation3], 4294966912  ;;  %v1580_v0 = vmov 0   ;;  %v56_v1 = vld [vmem:[%s2011_s0] sm:$0xff]  ;;  %v73_v3 = vld [vmem:[%s2013_s2 + $0x8] sm:$0xff]  ;;  %v58_v27 = vlaneseq  ;;  %v1581_v30 = vmov 1.0  }
  0x14   :  { %1475 = vset.pattern.permute.xlu0 %v1580_v0  ;;  %1476 = vset.pattern.permute.xlu1 %v1580_v0  ;;  %v72_v2 = vld [vmem:[%s2013_s2] sm:$0xff]  ;;  %v74_v4 = vld [vmem:[%s2013_s2 + $0x10] sm:$0xff]  ;;  %v75_v5 = vld [vmem:[%s2013_s2 + $0x18] sm:$0xff]  ;;  %vm165_vm2 = vcmask 261120   ;;  %s1582_s10 = smov 96   ;;  %vm311_vm3 = vcmask 130048  }
  0x15   :  { %61 = vperm.xlu0 %1475, %v56_v1   ;;  %v57_v6 = vld [vmem:[%s2011_s0 + $0x8] sm:$0xff]  ;;  %v1368_v7 = vpack.c.bf16 %v73_v3, %v72_v2  ;;  %v1372_v8 = vpack.c.bf16 %v75_v5, %v74_v4  ;;  %v76_v9 = vld [vmem:[%s2013_s2 + $0x20] sm:$0xff]  ;;  %v78_v12 = vld [vmem:[%s2013_s2 + $0x30] sm:$0xff]  ;;  %v1696_v28 = vand.u32 127, %v58_v27  ;;  %v1730_v61 = vshrl.u32 %v58_v27, 7  ;;  %s1584_s11 = smov 32  }
  0x16   :  { %v77_v10 = vld [vmem:[%s2013_s2 + $0x28] sm:$0xff]  ;;  %v79_v13 = vld [vmem:[%s2013_s2 + $0x38] sm:$0xff]  ;;  %v80_v15 = vld [vmem:[%s2013_s2 + $0x40] sm:$0xff]  ;;  %vm353_vm4 = vcmask 1041409   ;;  %vm356_vm5 = vcmask 58368   ;;  %vm424_vm6 = vcmask 654848  }
  0x17   :  { %1369 = vmatprep.subr.bf16.mxu0 %v1368_v7  ;;  %v1376_v11 = vpack.c.bf16 %v77_v10, %v76_v9  ;;  %v1380_v14 = vpack.c.bf16 %v79_v13, %v78_v12  ;;  %v81_v16 = vld [vmem:[%s2013_s2 + $0x48] sm:$0xff]  ;;  %v82_v18 = vld [vmem:[%s2013_s2 + $0x50] sm:$0xff]  ;;  %v83_v19 = vld [vmem:[%s2013_s2 + $0x58] sm:$0xff]  ;;  %v1733_v63 = vsub.s32 0, %v1730_v61  ;;  %v1738_v1 = vsub.s32 1, %v1730_v61  ;;  %s1588_s12 = smov 64  }
  0x18   :  { %1371 = vmatpush3.bf16.msra.mxu0 %v1368_v7  ;;  %v1384_v17 = vpack.c.bf16 %v81_v16, %v80_v15  ;;  %v1388_v20 = vpack.c.bf16 %v83_v19, %v82_v18  ;;  %v84_v21 = vld [vmem:[%s2013_s2 + $0x60] sm:$0xff]  ;;  %v85_v22 = vld [vmem:[%s2013_s2 + $0x68] sm:$0xff]  ;;  %v86_v24 = vld [vmem:[%s2013_s2 + $0x70] sm:$0xff]  ;;  %v207_v16 = vsub.s32 2, %v1730_v61  ;;  %vm540_vm7 = vcmask 786048   ;;  %s1589_s21 = smov [#allocation5]  }
  0x19   :  { %64 = vperm.xlu0 %1475, %v57_v6   ;;  %1373 = vmatprep.subr.bf16.mxu0 %v1372_v8  ;;  %v1392_v23 = vpack.c.bf16 %v85_v22, %v84_v21  ;;  %v87_v25 = vld [vmem:[%s2013_s2 + $0x78] sm:$0xff]  ;;  %v43_v32 = vld [vmem:[#allocation2 + $0x10] sm:$0xff]  ;;  %v1707_v49 = vld [vmem:[%s2014_s3] sm:$0xff]  ;;  %vm1586_vm8 = vmmov 0   ;;  %vm672_vm9 = vcmask 254976   ;;  %vm815_vm10 = vcmask 523264  }
  0x1a   :  { %v1396_v26 = vpack.c.bf16 %v87_v25, %v86_v24  ;;  %v1712_v50 = vld [vmem:[%s2014_s3 + $0x18] sm:$0xff]  ;;  %v1717_v51 = vld [vmem:[%s2014_s3 + $0x30] sm:$0xff]  ;;  %v1726_v54 = vld [vmem:[%s2014_s3 + $0x48] sm:$0xff]  ;;  %s1151_s6 = sshll.u32 %s1589_s21, 4  ;;  %s1152_s6 = int_to_ptr.vmem [resolvable:$true] %s1151_s6 }
  0x1b   :  { %v1477_v52 = vpack.i.bf16 %v1712_v50, %v1707_v49  ;;  %v1400_v53 = vpack.c.bf16 %v1712_v50, %v1707_v49  ;;  %v1404_v55 = vpack.c.bf16 %v1726_v54, %v1717_v51  ;;  %v1735_v0 = vld [vmem:[#allocation2] sm:$0xff]  ;;  %p1556_p9 = scmp.lt.s32.totalorder %s1152_s6, %s1152_s6 }
  0x1c   :  { %1375 = vmatpush3.bf16.msra.mxu0 %v1372_v8  ;;  %v196_v2 = vrot.slane %v1735_v0, %v1733_v63  ;;  %v202_v5 = vrot.slane %v1735_v0, %v1738_v1  ;;  %v290_v12 = vld [vmem:[%s2012_s1] sm:$0x3]  ;;  %s1583_s1 = smov 112  }
  0x1d   :  { %1377 = vmatprep.subr.bf16.mxu0 %v1376_v11  ;;  %1401 = vmatprep.subr.bf16.mxu1 %v1400_v53  ;;  %v291_v13 = vsub.f32 1.0, %v290_v12 }
  0x1e   :  { %1403 = vmatpush3.bf16.msra.mxu1 %v1400_v53 }
  0x1f   :  { %1405 = vmatprep.subr.bf16.mxu1 %v1404_v55 }
  0x20   :  { %1379 = vmatpush3.bf16.msra.mxu0 %v1376_v11 }
  0x21   :  { %1381 = vmatprep.subr.bf16.mxu0 %v1380_v14 }
  0x22   :  { %1407 = vmatpush3.bf16.msra.mxu1 %v1404_v55 }
  0x24   :  { %1383 = vmatpush3.bf16.msra.mxu0 %v1380_v14  ;;  %v292_v14 = vmul.f32 -1e+09, %v291_v13 }
  0x25   :  { %1385 = vmatprep.subr.bf16.mxu0 %v1384_v17 }
  0x26   :  { %v322_v15 = vrot.slane %v292_v14, %v1733_v63 }
  0x28   :  { %1387 = vmatpush3.bf16.msra.mxu0 %v1384_v17  ;;  %v208_v17 = vrot.slane %v1735_v0, %v207_v16 }
  0x29   :  { %1389 = vmatprep.subr.bf16.mxu0 %v1388_v20 }
  0x2c   :  { %1391 = vmatpush3.bf16.msra.mxu0 %v1388_v20 }
  0x2d   :  { %1393 = vmatprep.subr.bf16.mxu0 %v1392_v23 }
  0x30   :  { %1395 = vmatpush3.bf16.msra.mxu0 %v1392_v23 }
  0x31   :  { %1397 = vmatprep.subr.bf16.mxu0 %v1396_v26 }
  0x34   :  { %1399 = vmatpush3.bf16.msra.mxu0 %v1396_v26 }
  0x94   :  { %v62_v29 = vpop.permute.xlu0 %61 }
  0x95   :  { %vm66_vm0 = vcmp.eq.s32.totalorder %v1696_v28, %v62_v29 }
  0x96   :  { %1267 = vmatprep.mubr.msk.f32.mxu0 %vm66_vm0, %v1581_v30 }
  0x98   :  { %v65_v31 = vpop.permute.xlu0 %64 }
  0x99   :  { %vm67_vm1 = vcmp.eq.s32.totalorder %v1696_v28, %v65_v31 }
  0x9a   :  { %1268 = vmatmul.mubr.msk.f32.vlgmr.msra.gmra.mrb[0].mxu0 %vm67_vm1, %v1581_v30 }
 0x16d   :  { %v1269_v33 = vpop.f32.mrb[0].mxu0 }
 0x16e   :  { %v154_v34 = vpop.f32.mrb[1].mxu0  ;;  %v164_v36 = vadd.f32 %v1269_v33, %v43_v32 }
 0x16f   :  { %v163_v35 = vadd.f32 %v154_v34, %v43_v32 }
 0x170   :  { %v169_v38 = vsel %vm165_vm2, %v164_v36, 0.0 }
 0x171   :  { %v166_v37 = vsel %vm165_vm2, %v163_v35, 0.0 }
 0x172   :  { %167 = vadd.xlane.f32.xlu1 %v166_v37 }
 0x176   :  { %170 = vadd.xlane.f32.xlu1 %v169_v38 }
 0x1ff   :  { %v168_v39 = vpop.xlane.xlu1 %167 }
 0x200   :  { %v173_v40 = vmul.f32 0.03125, %v168_v39 }
 0x202   :  { %v175_v41 = vsub.f32 %v163_v35, %v173_v40 }
 0x203   :  { %v171_v42 = vpop.xlane.xlu1 %170 }
 0x204   :  { %v174_v43 = vmul.f32 0.03125, %v171_v42  ;;  %v177_v44 = vmul.f32 %v175_v41, %v175_v41 }
 0x206   :  { %v176_v45 = vsub.f32 %v164_v36, %v174_v43  ;;  %v179_v46 = vsel %vm165_vm2, %v177_v44, 0.0  ;;  %v329_v36 = vrot.slane %v292_v14, %v1738_v1 }
 0x207   :  { %180 = vadd.xlane.f32.xlu0 %v179_v46 }
 0x208   :  { %v178_v47 = vmul.f32 %v176_v45, %v176_v45 }
 0x20a   :  { %v182_v48 = vsel %vm165_vm2, %v178_v47, 0.0 }
 0x20b   :  { %183 = vadd.xlane.f32.xlu1 %v182_v48  ;;  %v347_v48 = vsub.s32 %v1696_v28, %v1730_v61 }
 0x21d   :  { %324 = vbcast.lane.b32.xlu0 %v322_v15, 256 }
 0x294   :  { %v181_v56 = vpop.xlane.xlu0 %180 }
 0x295   :  { %v185_v57 = vmul.f32 0.03125, %v181_v56 }
 0x297   :  { %v187_v58 = vadd.f32 1e-12, %v185_v57 }
 0x298   :  { %v184_v59 = vpop.xlane.xlu1 %183  ;;  %v325_v35 = vpop.permute.xlu0 %324 }
 0x299   :  { %1507 = vrsqrt.f32 %v187_v58  ;;  %v186_v60 = vmul.f32 0.03125, %v184_v59 }
 0x29b   :  { %v188_v62 = vadd.f32 1e-12, %v186_v60 }
 0x29d   :  { %1509 = vrsqrt.f32 %v188_v62 }
 0x2a3   :  { %v1508_v3 = vpop.eup %1507 }
 0x2a4   :  { %v191_v4 = vmul.f32 %v1508_v3, %v175_v41 }
 0x2a6   :  { %v197_v6 = vmul.f32 %v196_v2, %v191_v4 }
 0x2a7   :  { %v1510_v7 = vpop.eup %1509 }
 0x2a8   :  { %v192_v8 = vmul.f32 %v1510_v7, %v176_v45  ;;  %v1744_v9 = vadd.f32 %v202_v5, %v197_v6 }
 0x2aa   :  { %v198_v10 = vmul.f32 %v196_v2, %v192_v8  ;;  %1278 = vmatprep.mubr.msk.f32.mxu1 %vm165_vm2, %v1744_v9 }
 0x2ac   :  { %v1748_v11 = vadd.f32 %v202_v5, %v198_v10 }
 0x2ae   :  { %1279 = vmatmul.mubr.msk.f32.vlgmr.msra.gmra.mrb[0].mxu1 %vm165_vm2, %v1748_v11 }
 0x381   :  { %v1280_v18 = vpop.f32.mrb[0].mxu1 }
 0x382   :  { %v281_v19 = vpop.f32.mrb[1].mxu1  ;;  %v1763_v21 = vadd.f32 %v1280_v18, %v208_v17 }
 0x383   :  { %v1760_v20 = vadd.f32 %v281_v19, %v208_v17 }
 0x384   :  { %v300_v25 = vrot.slane %v1763_v21, %v1733_v63 }
 0x385   :  { %303 = vrot.lane.b32.xlu1 %v1760_v20, %s1582_s10  ;;  %v296_v22 = vrot.slane %v1760_v20, %v1733_v63 }
 0x389   :  { %305 = vrot.lane.b32.xlu1 %v1763_v21, %s1582_s10 }
 0x3f7   :  { %v304_v23 = vpop.permute.xlu1 %303 }
 0x3f8   :  { %v309_v24 = vmul.f32 %v304_v23, %v296_v22 }
 0x3fa   :  { %441 = vrot.lane.b32.xlu1 %v309_v24, %s1583_s1  ;;  %v312_v26 = vsel %vm311_vm3, %v309_v24, 0.0 }
 0x3fb   :  { %v306_v27 = vpop.permute.xlu1 %305  ;;  %313 = vadd.xlane.f32.xlu0 %v312_v26 }
 0x3fc   :  { %v310_v29 = vmul.f32 %v306_v27, %v300_v25 }
 0x3fe   :  { %443 = vrot.lane.b32.xlu1 %v310_v29, %s1583_s1  ;;  %v315_v30 = vsel %vm311_vm3, %v310_v29, 0.0 }
 0x422   :  { %316 = vadd.xlane.f32.xlu1 %v315_v30 }
 0x46c   :  { %v442_v31 = vpop.permute.xlu1 %441 }
 0x46d   :  { %v447_v34 = vsel %vm311_vm3, %v442_v31, 0.0 }
 0x470   :  { %v444_v32 = vpop.permute.xlu1 %443 }
 0x471   :  { %v450_v33 = vsel %vm311_vm3, %v444_v32, 0.0 }
 0x472   :  { %451 = vadd.xlane.f32.xlu0 %v450_v33 }
 0x476   :  { %448 = vadd.xlane.f32.xlu0 %v447_v34 }
 0x488   :  { %v314_v37 = vpop.xlane.xlu0 %313 }
 0x489   :  { %v335_v38 = vadd.f32 %v325_v35, %v314_v37 }
 0x48c   :  { %331 = vbcast.lane.b32.xlu0 %v329_v36, 256 }
 0x490   :  { %340 = vperm.xlu0 %1475, %v335_v38  }
 0x4af   :  { %v317_v42 = vpop.xlane.xlu1 %316 }
 0x4ff   :  { %v452_v39 = vpop.xlane.xlu0 %451 }
 0x503   :  { %v449_v40 = vpop.xlane.xlu0 %448 }
 0x504   :  { %v453_v41 = vadd.f32 %v449_v40, %v325_v35 }
 0x506   :  { %458 = vperm.xlu0 %1475, %v453_v41  }
 0x507   :  { %v332_v43 = vpop.permute.xlu0 %331 }
 0x508   :  { %v336_v44 = vadd.f32 %v332_v43, %v317_v42  ;;  %v454_v45 = vadd.f32 %v452_v39, %v332_v43 }
 0x50a   :  { %343 = vperm.xlu1 %1476, %v336_v44   ;;  %461 = vperm.xlu0 %1475, %v454_v45  }
 0x50f   :  { %v341_v46 = vpop.permute.xlu0 %340 }
 0x510   :  { %v348_v56 = vrot.slane %v341_v46, %v347_v48 }
 0x585   :  { %v459_v47 = vpop.permute.xlu0 %458 }
 0x586   :  { %v466_v57 = vrot.slane %v459_v47, %v347_v48 }
 0x589   :  { %v344_v53 = vpop.permute.xlu1 %343  ;;  %v462_v55 = vpop.permute.xlu0 %461 }
 0x58a   :  { %v352_v58 = vrot.slane %v344_v53, %v347_v48  ;;  %v470_v59 = vrot.slane %v462_v55, %v347_v48 }
 0x58c   :  { %v354_v60 = vsel %vm353_vm4, %v352_v58, %v348_v56  ;;  %v471_v62 = vsel %vm353_vm4, %v470_v59, %v466_v57  ;;  %v1482_v56 = vpack.i.bf16 %v1726_v54, %v1717_v51 }
 0x58d   :  { %v357_v2 = vsel %vm356_vm5, %v354_v60, -inf  ;;  %v473_v3 = vsel %vm356_vm5, %v471_v62, -inf }
 0x58e   :  { %358 = vmax.xlane.f32.xlu0 %v357_v2  ;;  %474 = vmax.xlane.f32.xlu1 %v473_v3 }
 0x61b   :  { %v475_v4 = vpop.xlane.xlu1 %474  ;;  %v359_v28 = vpop.xlane.xlu0 %358 }
 0x61c   :  { %v480_v5 = vrot.slane %v475_v4, %v1733_v63  ;;  %v364_v6 = vrot.slane %v359_v28, %v1733_v63  ;;  %v368_v7 = vrot.slane %v359_v28, %v1738_v1  ;;  %v484_v12 = vrot.slane %v475_v4, %v1738_v1 }
 0x61d   :  { %v1585_v28 = vmov 0.0|0.0  }
 0x61e   :  { %v371_v8 = vsub.f32 %v335_v38, %v364_v6  ;;  %v372_v10 = vsub.f32 %v336_v44, %v368_v7  ;;  %v487_v13 = vsub.f32 %v453_v41, %v480_v5  ;;  %v488_v17 = vsub.f32 %v454_v45, %v484_v12  ;;  %1408 = vmatprep.subr.bf16.mxu1 %v1585_v28 }
 0x61f   :  { %1438 = vmatprep.subr.bf16.mxu0 %v1585_v28 }
 0x620   :  { %v373_v14 = vmul.f32 1.442695, %v371_v8  ;;  %v375_v15 = vmul.f32 1.442695, %v372_v10  ;;  %v489_v18 = vmul.f32 1.442695, %v487_v13 }
 0x621   :  { %v491_v19 = vmul.f32 1.442695, %v488_v17 }
 0x622   :  { %1511 = vpow2.f32 %v373_v14 }
 0x623   :  { %1513 = vpow2.f32 %v375_v15 }
 0x624   :  { %1515 = vpow2.f32 %v489_v18 }
 0x625   :  { %1517 = vpow2.f32 %v491_v19 }
 0x62c   :  { %v1512_v22 = vpop.eup %1511 }
 0x62d   :  { %v1514_v23 = vpop.eup %1513  ;;  %380 = vperm.xlu0 %1475, %v1512_v22  }
 0x62e   :  { %383 = vperm.xlu1 %1476, %v1514_v23   ;;  %v1516_v24 = vpop.eup %1515 }
 0x62f   :  { %v1518_v25 = vpop.eup %1517 }
 0x631   :  { %496 = vperm.xlu0 %1475, %v1516_v24  }
 0x635   :  { %499 = vperm.xlu0 %1475, %v1518_v25  }
 0x6ac   :  { %v381_v26 = vpop.permute.xlu0 %380 }
 0x6ad   :  { %v384_v27 = vpop.permute.xlu1 %383  ;;  %v388_v29 = vrot.slane %v381_v26, %v347_v48 }
 0x6ae   :  { %v392_v30 = vrot.slane %v384_v27, %v347_v48 }
 0x6b0   :  { %v497_v31 = vpop.permute.xlu0 %496  ;;  %v393_v32 = vsel %vm353_vm4, %v392_v30, %v388_v29 }
 0x6b1   :  { %v395_v33 = vsel %vm356_vm5, %v393_v32, 0.0  ;;  %v504_v35 = vrot.slane %v497_v31, %v347_v48 }
 0x6b2   :  { %396 = vadd.xlane.f32.xlu1 %v395_v33 }
 0x6b4   :  { %v500_v34 = vpop.permute.xlu0 %499 }
 0x6b5   :  { %v508_v36 = vrot.slane %v500_v34, %v347_v48 }
 0x6b7   :  { %v509_v37 = vsel %vm353_vm4, %v508_v36, %v504_v35 }
 0x6b8   :  { %v511_v38 = vsel %vm356_vm5, %v509_v37, 0.0 }
 0x6b9   :  { %512 = vadd.xlane.f32.xlu0 %v511_v38 }
 0x73f   :  { %v397_v39 = vpop.xlane.xlu1 %396 }
 0x740   :  { %1519 = vrcp.f32 %v397_v39 }
 0x746   :  { %v513_v40 = vpop.xlane.xlu0 %512 }
 0x747   :  { %1521 = vrcp.f32 %v513_v40 }
 0x74a   :  { %v1520_v41 = vpop.eup %1519 }
 0x74b   :  { %v407_v42 = vrot.slane %v1520_v41, %v1738_v1  ;;  %v403_v43 = vrot.slane %v1520_v41, %v1733_v63 }
 0x74d   :  { %v411_v44 = vmul.f32 %v1514_v23, %v407_v42  ;;  %v410_v45 = vmul.f32 %v1512_v22, %v403_v43 }
 0x74f   :  { %419 = vperm.xlu1 %1476, %v411_v44   ;;  %414 = vperm.xlu0 %1475, %v410_v45  }
 0x751   :  { %v1522_v46 = vpop.eup %1521 }
 0x752   :  { %v523_v47 = vrot.slane %v1522_v46, %v1738_v1  ;;  %v519_v48 = vrot.slane %v1522_v46, %v1733_v63  ;;  %v570_v46 = vsub.s32 3, %v1730_v61 }
 0x754   :  { %v527_v53 = vmul.f32 %v1518_v25, %v523_v47  ;;  %v526_v55 = vmul.f32 %v1516_v24, %v519_v48  ;;  %v1587_v25 = vmov 0.0   ;;  %v571_v47 = vrot.slane %v1735_v0, %v570_v46 }
 0x755   :  { %1289 = vmatprep.mubr.msk.f32.mxu1 %vm1586_vm8, %v1587_v25  ;;  %1365 = vmatprep.mubr.msk.f32.mxu0 %vm1586_vm8, %v1587_v25 }
 0x756   :  { %535 = vperm.xlu0 %1475, %v527_v53   ;;  %530 = vperm.xlu1 %1476, %v526_v55  }
 0x75a   :  { %1478 = vrot.lane.b32.xlu1 %v1477_v52, %s1584_s11  ;;  %1483 = vrot.lane.b32.xlu0 %v1482_v56, %s1584_s11 }
 0x7ce   :  { %v420_v57 = vpop.permute.xlu1 %419  ;;  %v415_v58 = vpop.permute.xlu0 %414 }
 0x7cf   :  { %v423_v59 = vmul.f32 %v420_v57, %v1763_v21  ;;  %v422_v60 = vmul.f32 %v415_v58, %v1760_v20 }
 0x7d1   :  { %v432_v62 = vsel %vm424_vm6, %v423_v59, 0.0  ;;  %v425_v2 = vsel %vm424_vm6, %v422_v60, 0.0 }
 0x7d2   :  { %v433_v3 = vrot.slane %v432_v62, 4  ;;  %v426_v4 = vrot.slane %v425_v2, 4 }
 0x7d4   :  { %v434_v49 = vadd.f32 %v433_v3, %v432_v62  ;;  %v427_v50 = vadd.f32 %v426_v4, %v425_v2 }
 0x7d5   :  { %v531_v51 = vpop.permute.xlu1 %530  ;;  %v536_v52 = vpop.permute.xlu0 %535 }
 0x7d6   :  { %v435_v54 = vrot.slane %v434_v49, 2  ;;  %v428_v5 = vrot.slane %v427_v50, 2  ;;  %v538_v6 = vmul.f32 %v531_v51, %v1760_v20  ;;  %v539_v7 = vmul.f32 %v536_v52, %v1763_v21 }
 0x7d8   :  { %v436_v8 = vadd.f32 %v435_v54, %v434_v49  ;;  %v429_v10 = vadd.f32 %v428_v5, %v427_v50  ;;  %v541_v12 = vsel %vm540_vm7, %v538_v6, 0.0  ;;  %v548_v13 = vsel %vm540_vm7, %v539_v7, 0.0  ;;  %v1836_v6 = vld [vmem:[%s2014_s3 + $0x20] sm:$0xff]  ;;  %v1841_v7 = vld [vmem:[%s2014_s3 + $0x38] sm:$0xff] }
 0x7d9   :  { %v542_v14 = vrot.slane %v541_v12, 4  ;;  %v549_v15 = vrot.slane %v548_v13, 4  ;;  %v1479_v17 = vpop.permute.xlu1 %1478  ;;  %v1484_v18 = vpop.permute.xlu0 %1483 }
 0x7da   :  { %v437_v19 = vrot.slane %v436_v8, 1  ;;  %v430_v22 = vrot.slane %v429_v10, 1  ;;  %v1481_v23 = vunpack.i.h.bf16 %v1479_v17  ;;  %v1480_v24 = vunpack.i.l.bf16 %v1479_v17 }
 0x7db   :  { %v543_v20 = vadd.f32 %v542_v14, %v541_v12  ;;  %v550_v21 = vadd.f32 %v549_v15, %v548_v13  ;;  %v1486_v26 = vunpack.i.h.bf16 %v1484_v18  ;;  %v1485_v27 = vunpack.i.l.bf16 %v1484_v18 }
 0x7dc   :  { %v431_v29 = vadd.f32 %v430_v22, %v429_v10  ;;  %v438_v30 = vadd.f32 %v437_v19, %v436_v8  ;;  %v1409_v31 = vpack.c.bf16 %v1481_v23, %v1480_v24  ;;  %v1848_v10 = vld [vmem:[%s2014_s3 + $0x50] sm:$0xff]  ;;  %v704_v17 = vsub.s32 4, %v1730_v61 }
 0x7dd   :  { %v544_v32 = vrot.slane %v543_v20, 2  ;;  %v551_v33 = vrot.slane %v550_v21, 2  ;;  %v1412_v35 = vpack.c.bf16 %v1486_v26, %v1485_v27  ;;  %v1418_v12 = vpack.c.bf16 %v1848_v10, %v1841_v7 }
 0x7de   :  { %v557_v34 = vsel %vm353_vm4, %v438_v30, %v431_v29  ;;  %1410 = vmatpush3.bf16.msra.mxu1 %v1409_v31  ;;  %v705_v23 = vrot.slane %v1735_v0, %v704_v17  ;;  %v710_v24 = vsub.s32 5, %v1730_v61 }
 0x7df   :  { %v545_v36 = vadd.f32 %v544_v32, %v543_v20  ;;  %v552_v37 = vadd.f32 %v551_v33, %v550_v21  ;;  %558 = vrot.lane.b32.xlu1 %v557_v34, %s1588_s12  ;;  %1411 = vmatprep.subr.bf16.mxu1 %v1585_v28  ;;  %v803_v33 = vld [vmem:[%s2015_s4] sm:$0xff]  ;;  %v804_v34 = vld [vmem:[%s2015_s4 + $0x8] sm:$0xff] }
 0x7e0   :  { %v711_v27 = vrot.slane %v1735_v0, %v710_v24 }
 0x7e1   :  { %v546_v38 = vrot.slane %v545_v36, 1  ;;  %v553_v39 = vrot.slane %v552_v37, 1 }
 0x7e2   :  { %1413 = vmatpush3.bf16.msra.mxu1 %v1412_v35  ;;  %v1421_v35 = vpack.c.bf16 %v804_v34, %v803_v33 }
 0x7e3   :  { %v547_v40 = vadd.f32 %v546_v38, %v545_v36  ;;  %v554_v41 = vadd.f32 %v553_v39, %v552_v37  ;;  %1414 = vmatprep.subr.bf16.mxu1 %v1585_v28  ;;  %v805_v36 = vld [vmem:[%s2015_s4 + $0x10] sm:$0xff]  ;;  %v806_v37 = vld [vmem:[%s2015_s4 + $0x18] sm:$0xff]  ;;  %v807_v39 = vld [vmem:[%s2015_s4 + $0x20] sm:$0xff] }
 0x7e4   :  { %v1424_v38 = vpack.c.bf16 %v806_v37, %v805_v36 }
 0x7e5   :  { %v563_v42 = vsel %vm353_vm4, %v554_v41, %v547_v40  ;;  %v808_v40 = vld [vmem:[%s2015_s4 + $0x28] sm:$0xff] }
 0x7e6   :  { %564 = vrot.lane.b32.xlu0 %v563_v42, %s1588_s12  ;;  %v1427_v41 = vpack.c.bf16 %v808_v40, %v807_v39  ;;  %v809_v42 = vld [vmem:[%s2015_s4 + $0x30] sm:$0xff]  ;;  %v1054_v40 = vld [vmem:[%s2016_s5] sm:$0xff] }
 0x851   :  { %v559_v43 = vpop.permute.xlu1 %558 }
 0x858   :  { %v565_v44 = vpop.permute.xlu0 %564 }
 0x859   :  { %v567_v45 = vsel %vm311_vm3, %v559_v43, %v565_v44  ;;  %v810_v43 = vld [vmem:[%s2015_s4 + $0x38] sm:$0xff] }
 0x85a   :  { %1290 = vmatmul.mubr.msk.f32.vlgmr.msra.gmra.mrb[2].mxu1 %vm165_vm2, %v567_v45  ;;  %v1430_v44 = vpack.c.bf16 %v810_v43, %v809_v42  ;;  %v716_v45 = vsub.s32 6, %v1730_v61  ;;  %v1056_v42 = vld [vmem:[%s2016_s5 + $0x10] sm:$0xff] }
 0x85b   :  { %1300 = vmatprep.mubr.msk.f32.mxu1 %vm1586_vm8, %v1587_v25 }
 0x92d   :  { %v657_v48 = vpop.f32.mrb[2].mxu1 }
 0x92e   :  { %v658_v53 = vadd.f32 %v657_v48, %v571_v47  ;;  %v1291_v55 = vpop.f32.mrb[3].mxu1  ;;  %v717_v47 = vrot.slane %v1735_v0, %v716_v45  ;;  %v1058_v45 = vld [vmem:[%s2016_s5 + $0x20] sm:$0xff] }
 0x930   :  { %v662_v56 = vrot.slane %v658_v53, 1  ;;  %v665_v58 = vadd.f32 %v658_v53, %v1744_v9  ;;  %v1831_v9 = vld [vmem:[%s2014_s3 + $0x8] sm:$0xff] }
 0x931   :  { %v1415_v8 = vpack.c.bf16 %v1836_v6, %v1831_v9 }
 0x932   :  { %v666_v57 = vadd.f32 %v662_v56, %v1748_v11 }
 0x933   :  { %1416 = vmatpush3.bf16.msra.mxu1 %v1415_v8 }
 0x934   :  { %v669_v59 = vrot.slane %v666_v57, 7  ;;  %1417 = vmatprep.subr.bf16.mxu1 %v1585_v28 }
 0x936   :  { %v670_v60 = vsel %vm353_vm4, %v669_v59, %v665_v58 }
 0x937   :  { %v673_v62 = vsel %vm672_vm9, %v670_v60, 0.0  ;;  %1419 = vmatpush3.bf16.msra.mxu1 %v1418_v12 }
 0x938   :  { %674 = vadd.xlane.f32.xlu1 %v673_v62  ;;  %1420 = vmatprep.subr.bf16.mxu1 %v1585_v28 }
 0x9c5   :  { %v675_v2 = vpop.xlane.xlu1 %674 }
 0x9c6   :  { %v676_v3 = vmul.f32 0.03125, %v675_v2 }
 0x9c8   :  { %v678_v4 = vrot.slane %v676_v3, 1  ;;  %v681_v49 = vsub.f32 %v665_v58, %v676_v3 }
 0x9ca   :  { %v682_v50 = vsub.f32 %v666_v57, %v678_v4  ;;  %v683_v52 = vmul.f32 %v681_v49, %v681_v49 }
 0x9cc   :  { %v684_v51 = vmul.f32 %v682_v50, %v682_v50 }
 0x9ce   :  { %v687_v54 = vrot.slane %v684_v51, 7  ;;  %v813_v51 = vsub.s32 7, %v1730_v61 }
 0x9d0   :  { %v688_v5 = vsel %vm353_vm4, %v687_v54, %v683_v52  ;;  %v814_v52 = vrot.slane %v1735_v0, %v813_v51  ;;  %v55_v0 = vld [vmem:[%s2014_s3 + $0x58] sm:$0xff] }
 0x9d1   :  { %v690_v11 = vsel %vm672_vm9, %v688_v5, 0.0 }
 0x9d2   :  { %691 = vadd.xlane.f32.xlu0 %v690_v11 }
 0xa5f   :  { %v692_v13 = vpop.xlane.xlu0 %691 }
 0xa60   :  { %v693_v14 = vmul.f32 0.03125, %v692_v13 }
 0xa62   :  { %v694_v15 = vadd.f32 1e-12, %v693_v14 }
 0xa64   :  { %1523 = vrsqrt.f32 %v694_v15 }
 0xa6e   :  { %v1524_v18 = vpop.eup %1523 }
 0xa6f   :  { %v697_v19 = vrot.slane %v1524_v18, 1  ;;  %v700_v22 = vmul.f32 %v1524_v18, %v681_v49  ;;  %v49_v49 = vld [vmem:[%s2014_s3 + $0x28] sm:$0xff]  ;;  %v1502_v18 = vpack.i.bf16 %v55_v0, %v1848_v10 }
 0xa71   :  { %v701_v20 = vmul.f32 %v697_v19, %v682_v50  ;;  %v706_v21 = vmul.f32 %v705_v23, %v700_v22  ;;  %v1492_v50 = vpack.i.bf16 %v49_v49, %v1836_v6  ;;  %v46_v6 = vld [vmem:[%s2014_s3 + $0x10] sm:$0xff] }
 0xa72   :  { %v1487_v17 = vpack.i.bf16 %v46_v6, %v1831_v9  ;;  %v42_v6 = vld [vmem:[#allocation2 + $0x8] sm:$0xff] }
 0xa73   :  { %v707_v26 = vmul.f32 %v705_v23, %v701_v20  ;;  %v712_v30 = vadd.f32 %v711_v27, %v706_v21  ;;  %1493 = vrot.lane.b32.xlu1 %v1492_v50, %s1588_s12 }
 0xa75   :  { %v713_v29 = vadd.f32 %v711_v27, %v707_v26 }
 0xa77   :  { %v720_v31 = vrot.slane %v713_v29, 7 }
 0xa79   :  { %v721_v32 = vsel %vm353_vm4, %v720_v31, %v712_v30 }
 0xa7a   :  { %1301 = vmatmul.mubr.msk.f32.vlgmr.msra.gmra.mrb[4].mxu1 %vm165_vm2, %v721_v32 }
 0xa7b   :  { %1319 = vmatprep.mubr.msk.f32.mxu1 %vm1586_vm8, %v1587_v25  ;;  %1422 = vmatpush3.bf16.msra.mxu1 %v1421_v35 }
 0xa7c   :  { %1423 = vmatprep.subr.bf16.mxu1 %v1585_v28 }
 0xa7f   :  { %1425 = vmatpush3.bf16.msra.mxu1 %v1424_v38  ;;  %v52_v38 = vld [vmem:[%s2014_s3 + $0x40] sm:$0xff] }
 0xa80   :  { %1426 = vmatprep.subr.bf16.mxu1 %v1585_v28  ;;  %v1497_v39 = vpack.i.bf16 %v52_v38, %v1841_v7 }
 0xa83   :  { %1428 = vmatpush3.bf16.msra.mxu1 %v1427_v41  ;;  %v1055_v41 = vld [vmem:[%s2016_s5 + $0x8] sm:$0xff] }
 0xa84   :  { %1429 = vmatprep.subr.bf16.mxu1 %v1585_v28  ;;  %v1439_v43 = vpack.c.bf16 %v1055_v41, %v1054_v40 }
 0xa86   :  { %1440 = vmatpush3.bf16.msra.mxu0 %v1439_v43 }
 0xa87   :  { %1431 = vmatpush3.bf16.msra.mxu1 %v1430_v44  ;;  %v1057_v44 = vld [vmem:[%s2016_s5 + $0x18] sm:$0xff]  ;;  %1441 = vmatprep.subr.bf16.mxu0 %v1585_v28 }
 0xa88   :  { %1432 = vmatprep.subr.bf16.mxu1 %v1585_v28  ;;  %v1442_v7 = vpack.c.bf16 %v1057_v44, %v1056_v42 }
 0xa8a   :  { %1443 = vmatpush3.bf16.msra.mxu0 %v1442_v7 }
 0xa8b   :  { %1444 = vmatprep.subr.bf16.mxu0 %v1585_v28 }
 0xae5   :  { %v1494_v19 = vpop.permute.xlu1 %1493 }
 0xae6   :  { %v1496_v23 = vunpack.i.h.bf16 %v1494_v19  ;;  %v1495_v24 = vunpack.i.l.bf16 %v1494_v19 }
 0xae8   :  { %v974_v26 = vsel %vm815_vm10, %v1495_v24, %v1496_v23  ;;  %v938_v24 = vrot.slane %v42_v6, %v1738_v1  ;;  %v944_v1 = vrot.slane %v42_v6, %v207_v16 }
 0xb4d   :  { %v790_v48 = vpop.f32.mrb[4].mxu1 }
 0xb4e   :  { %v791_v53 = vadd.f32 %v790_v48, %v717_v47  ;;  %v1302_v55 = vpop.f32.mrb[5].mxu1  ;;  %v1059_v47 = vld [vmem:[%s2016_s5 + $0x28] sm:$0xff] }
 0xb4f   :  { %v1445_v48 = vpack.c.bf16 %v1059_v47, %v1058_v45  ;;  %v1061_v55 = vld [vmem:[%s2016_s5 + $0x38] sm:$0xff] }
 0xb50   :  { %v794_v56 = vmul.f32 %v791_v53, %v791_v53 }
 0xb51   :  { %1446 = vmatpush3.bf16.msra.mxu0 %v1445_v48 }
 0xb52   :  { %v795_v57 = vmul.f32 %v794_v56, %v791_v53  ;;  %1447 = vmatprep.subr.bf16.mxu0 %v1585_v28 }
 0xb54   :  { %v796_v58 = vmul.f32 0.044715, %v795_v57  ;;  %v1062_v57 = vld [vmem:[%s2016_s5 + $0x40] sm:$0xff] }
 0xb56   :  { %v797_v59 = vadd.f32 %v796_v58, %v791_v53  ;;  %v1063_v58 = vld [vmem:[%s2016_s5 + $0x48] sm:$0xff] }
 0xb58   :  { %v798_v60 = vmul.f32 0.7978846, %v797_v59  ;;  %v1451_v59 = vpack.c.bf16 %v1063_v58, %v1062_v57 }
 0xb5a   :  { %1525 = vtanh.f32 %v798_v60  ;;  %v1064_v60 = vld [vmem:[%s2016_s5 + $0x50] sm:$0xff] }
 0xb64   :  { %v1526_v62 = vpop.eup %1525 }
 0xb65   :  { %v800_v2 = vadd.f32 1.0, %v1526_v62  ;;  %v1065_v62 = vld [vmem:[%s2016_s5 + $0x58] sm:$0xff] }
 0xb67   :  { %v801_v3 = vmul.f32 0.5, %v800_v2  ;;  %v1454_v2 = vpack.c.bf16 %v1065_v62, %v1064_v60 }
 0xb69   :  { %v802_v4 = vmul.f32 %v801_v3, %v791_v53  ;;  %v1060_v53 = vld [vmem:[%s2016_s5 + $0x30] sm:$0xff]  ;;  %v1066_v3 = vld [vmem:[%s2016_s5 + $0x60] sm:$0xff] }
 0xb6a   :  { %v1448_v56 = vpack.c.bf16 %v1061_v55, %v1060_v53 }
 0xb6b   :  { %1320 = vmatmul.mubr.msk.f32.vlgmr.msra.gmra.mrb[6].mxu1 %vm815_vm10, %v802_v4  ;;  %v1067_v4 = vld [vmem:[%s2016_s5 + $0x68] sm:$0xff] }
 0xb6c   :  { %1330 = vmatprep.mubr.msk.f32.mxu1 %vm1586_vm8, %v1587_v25  ;;  %1449 = vmatpush3.bf16.msra.mxu0 %v1448_v56  ;;  %v1457_v49 = vpack.c.bf16 %v1067_v4, %v1066_v3 }
 0xb6d   :  { %1450 = vmatprep.subr.bf16.mxu0 %v1585_v28 }
 0xb70   :  { %1452 = vmatpush3.bf16.msra.mxu0 %v1451_v59 }
 0xb71   :  { %1453 = vmatprep.subr.bf16.mxu0 %v1585_v28 }
 0xb74   :  { %1455 = vmatpush3.bf16.msra.mxu0 %v1454_v2 }
 0xb75   :  { %1456 = vmatprep.subr.bf16.mxu0 %v1585_v28 }
 0xb78   :  { %1458 = vmatpush3.bf16.msra.mxu0 %v1457_v49 }
 0xb79   :  { %1459 = vmatprep.subr.bf16.mxu0 %v1585_v28 }
 0xc3e   :  { %v885_v54 = vpop.f32.mrb[6].mxu1 }
 0xc3f   :  { %v886_v5 = vadd.f32 %v885_v54, %v814_v52  ;;  %v1321_v11 = vpop.f32.mrb[7].mxu1 }
 0xc41   :  { %v890_v8 = vrot.slane %v886_v5, 1  ;;  %v893_v13 = vadd.f32 %v886_v5, %v712_v30 }
 0xc43   :  { %v894_v12 = vadd.f32 %v890_v8, %v713_v29 }
 0xc45   :  { %v897_v14 = vrot.slane %v894_v12, 7 }
 0xc47   :  { %v898_v25 = vsel %vm353_vm4, %v897_v14, %v893_v13 }
 0xc48   :  { %v900_v15 = vsel %vm672_vm9, %v898_v25, 0.0 }
 0xc49   :  { %901 = vadd.xlane.f32.xlu0 %v900_v15 }
 0xc5f   :  { %1488 = vrot.lane.b32.xlu0 %v1487_v17, %s1588_s12 }
 0xc63   :  { %1503 = vrot.lane.b32.xlu0 %v1502_v18, %s1588_s12  ;;  %v932_v18 = vrot.slane %v42_v6, %v1733_v63  ;;  %v1069_v63 = vld [vmem:[%s2016_s5 + $0x78] sm:$0xff] }
 0xcd6   :  { %v902_v22 = vpop.xlane.xlu0 %901 }
 0xcd7   :  { %v903_v20 = vmul.f32 0.03125, %v902_v22 }
 0xcd9   :  { %v905_v21 = vrot.slane %v903_v20, 1  ;;  %v1915_v9 = vsub.f32 %v893_v13, %v903_v20 }
 0xcda   :  { %v1489_v27 = vpop.permute.xlu0 %1488 }
 0xcdb   :  { %v1917_v29 = vsub.f32 %v894_v12, %v905_v21  ;;  %v1491_v30 = vunpack.i.h.bf16 %v1489_v27  ;;  %v1490_v31 = vunpack.i.l.bf16 %v1489_v27  ;;  %v910_v34 = vmul.f32 %v1915_v9, %v1915_v9 }
 0xcdd   :  { %v911_v10 = vmul.f32 %v1917_v29, %v1917_v29  ;;  %v973_v32 = vsel %vm815_vm10, %v1490_v31, %v1491_v30  ;;  %v1068_v30 = vld [vmem:[%s2016_s5 + $0x70] sm:$0xff]  ;;  %s1551_s5 = scalar_lea.vmem %s1152_s6, 32 }
 0xcde   :  { %v1433_v33 = vpack.c.bf16 %v974_v26, %v973_v32  ;;  %v1504_v50 = vpop.permute.xlu0 %1503  ;;  %p1552_p8 = scmp.ne.s32.totalorder %s1152_s6, %s1551_s5  ;;  %p1557_p10 = scmp.lt.s32.totalorder %s1551_s5, %s1551_s5 }
 0xcdf   :  { %v914_v35 = vrot.slane %v911_v10, 7  ;;  %v1506_v54 = vunpack.i.h.bf16 %v1504_v50  ;;  %v1505_v5 = vunpack.i.l.bf16 %v1504_v50 }
 0xce0   :  { %1434 = vmatpush3.bf16.msra.mxu1 %v1433_v33  ;;  %v1073_v33 = vrot.slane %v42_v6, %v570_v46  ;;  %p1558_p11 = por %p1557_p10, %p1556_p9 }
 0xce1   :  { %v915_v36 = vsel %vm353_vm4, %v914_v35, %v910_v34  ;;  %1435 = vmatprep.subr.bf16.mxu1 %v1585_v28  ;;  %v976_v14 = vsel %vm815_vm10, %v1505_v5, %v1506_v54 }
 0xce2   :  { %v917_v37 = vsel %vm672_vm9, %v915_v36, 0.0  ;;  %p1559_p12 = pnand %p1558_p11, %p1552_p8 }
 0xce3   :  { %918 = vadd.xlane.f32.xlu1 %v917_v37 }
 0xcf4   :  { %1498 = vrot.lane.b32.xlu1 %v1497_v39, %s1588_s12 }
 0xd70   :  { %v919_v51 = vpop.xlane.xlu1 %918 }
 0xd71   :  { %v920_v52 = vmul.f32 0.03125, %v919_v51 }
 0xd73   :  { %v921_v11 = vadd.f32 1e-12, %v920_v52 }
 0xd74   :  { %v1499_v8 = vpop.permute.xlu1 %1498 }
 0xd75   :  { %1527 = vrsqrt.f32 %v921_v11  ;;  %v1501_v12 = vunpack.i.h.bf16 %v1499_v8  ;;  %v1500_v13 = vunpack.i.l.bf16 %v1499_v8 }
 0xd77   :  { %v975_v25 = vsel %vm815_vm10, %v1500_v13, %v1501_v12 }
 0xd78   :  { %v1436_v15 = vpack.c.bf16 %v976_v14, %v975_v25 }
 0xd7a   :  { %1437 = vmatpush3.bf16.msra.mxu1 %v1436_v15 }
 0xd7f   :  { %v1528_v17 = vpop.eup %1527 }
 0xd80   :  { %v924_v0 = vrot.slane %v1528_v17, 1  ;;  %v927_v28 = vmul.f32 %v1528_v17, %v1915_v9  ;;  %v1460_v9 = vpack.c.bf16 %v1069_v63, %v1068_v30 }
 0xd82   :  { %v928_v19 = vmul.f32 %v924_v0, %v1917_v29  ;;  %v933_v22 = vmul.f32 %v932_v18, %v927_v28  ;;  %1461 = vmatpush3.bf16.msra.mxu0 %v1460_v9 }
 0xd84   :  { %v934_v23 = vmul.f32 %v932_v18, %v928_v19  ;;  %v939_v21 = vadd.f32 %v938_v24, %v933_v22 }
 0xd86   :  { %v940_v20 = vadd.f32 %v938_v24, %v934_v23 }
 0xd88   :  { %v947_v26 = vrot.slane %v940_v20, 7 }
 0xd8a   :  { %v948_v27 = vsel %vm353_vm4, %v947_v26, %v939_v21 }
 0xd8b   :  { %1331 = vmatmul.mubr.msk.f32.vlgmr.msra.gmra.mrb[8].mxu1 %vm165_vm2, %v948_v27 }
 0xe5e   :  { %v1049_v29 = vpop.f32.mrb[8].mxu1 }
 0xe5f   :  { %v1050_v31 = vadd.f32 %v1049_v29, %v944_v1  ;;  %v1332_v10 = vpop.f32.mrb[9].mxu1 }
 0xe61   :  { %v1053_v32 = vmax.f32 %v1050_v31, 0.0 }
 0xe63   :  { %1366 = vmatmul.mubr.f32.vlgmr.msra.gmra.mrb[2].mxu0 %v1053_v32 }
 0xf36   :  { %v1140_v34 = vpop.f32.mrb[2].mxu0 }
 0xf37   :  { %v1141_v35 = vadd.f32 %v1140_v34, %v1073_v33  ;;  %v1367_v36 = vpop.f32.mrb[3].mxu0 }
 0xf39   :  { %1144 = vst [vmem:[#allocation5] sm:$0x3] %v1141_v35 }
 0xf3a   :  { %1562 = shalt.err (!%p1559_p12)
}
 0xf3b   :  { %s1563_s24 = scalar_lea.hbm %s2018_s7, 32 }
 0xf3c   :  { %p1564_p13 = scmp.ne.s32.totalorder %s2018_s7, %s1563_s24  ;;  %p1567_p0 = scmp.lt.u32.totalorder %s1563_s24, %s2018_s7 }
 0xf3e   :  { %p1569_p1 = pnand %p1567_p0, %p1564_p13 }
 0xf40   :  { %1572 = shalt.err (!%p1569_p1)
}
 0xf41   :  { %1154 = dma.vmem_to_hbm [thread:$0]  %s1152_s6, 32, %s2018_s7, [#allocation4]  }
 0xf42   :  { %1575 = dma.done.wait [#allocation4], 32  }
 0xf43   :  { %1576 = vsyncadd [#allocation4], 4294967264 }
 0xf44   :  { %1158 = vsyncpa [#allocation3], 1 }
 0xf45   :  { %1159 = vsyncpa [#allocation4], 1 }

</bundles_post_ra>
